<compile_context>
chip_gen: v6e
topology: v6e:2x2x1
jax: 0.10.0
libtpu: 0.0.40
codegen_flags: <defaults>
</compile_context>

<pallas_src>
import functools

import jax
import jax.numpy as jnp
from jax import lax
from jax.experimental import pallas as pl
from jax.experimental.pallas import tpu as pltpu


def _ntxent_kernel(zi_ref, zj_ref, out_ref, *, block_rows, temperature):
    TB = block_rows
    inv_t = 1.0 / float(temperature)
    r = pl.program_id(0)
    row0 = pl.multiple_of(r * TB, TB)

    # Resident, already-normalized halves (f32).
    zi_c = zi_ref[...]                       # (B, D) i columns
    zj_c = zj_ref[...]                       # (B, D) j columns
    zi_r = zi_ref[pl.ds(row0, TB), :]        # (TB, D) i rows of this tile
    zj_r = zj_ref[pl.ds(row0, TB), :]        # (TB, D) j rows of this tile

    # positives[k] = sim[k, k+B] = sim[k+B, k] = <zi_k, zj_k>; keep full f32
    # since it feeds the numerator term of the loss directly.
    pos = jnp.sum(zi_r * zj_r, axis=1)       # (TB,)

    # bf16 operands for the MXU (f32 accumulate).
    zi_cb = zi_c.astype(jnp.bfloat16)
    zj_cb = zj_c.astype(jnp.bfloat16)
    zi_rb = zi_r.astype(jnp.bfloat16)
    zj_rb = zj_r.astype(jnp.bfloat16)

    # Contract dim 1 of both operands (A @ B^T): MXU-fed directly, no transpose.
    dn = (((1,), (1,)), ((), ()))

    def sum_exp_rows(rows_b, cols_b):
        # One Gram block at a time: matmul -> exp -> row-reduce, so only one
        # (TB, B) f32 temporary is live at a time (bounded VMEM on v7x).
        s = lax.dot_general(rows_b, cols_b, dn,
                            preferred_element_type=jnp.float32)   # (TB, B)
        return jnp.sum(jnp.exp(s * inv_t), axis=1)                # (TB,)

    # Self-similarity diagonal, computed from the SAME bf16 operands the MXU
    # sees (exact products, f32 accumulate), so subtracting it cancels the
    # diagonal of the unmasked row sums to ~1e-6.
    self_i = jnp.exp(jnp.sum(jnp.square(zi_rb.astype(jnp.float32)), axis=1) * inv_t)
    self_j = jnp.exp(jnp.sum(jnp.square(zj_rb.astype(jnp.float32)), axis=1) * inv_t)

    den_i = sum_exp_rows(zi_rb, zi_cb) - self_i + sum_exp_rows(zi_rb, zj_cb)
    den_j = sum_exp_rows(zj_rb, zj_cb) - self_j + sum_exp_rows(zj_rb, zi_cb)

    # -log(exp(pos/t) / den) == log(den) - pos/t
    out_ref[0, :] = jnp.log(den_i) - pos * inv_t    # rows k       (i half)
    out_ref[1, :] = jnp.log(den_j) - pos * inv_t    # rows k + B   (j half)


def ntxent_loss(emb_i, emb_j, *, temperature=0.5, block_rows=None):
    """Pallas TPU implementation of NTXent.forward(emb_i, emb_j)."""
    assert emb_i.shape == emb_j.shape and emb_i.ndim == 2
    B, D = emb_i.shape

    # Normalize once (f32) in the wrapper: matches F.normalize(x, dim=1),
    # avoids per-grid-step re-normalization, and keeps the row-tile grid axis
    # a pure "parallel" axis (no cross-iteration scratch init => v7x megacore
    # sharding stays correct).
    def l2_normalize(x):
        x = x.astype(jnp.float32)
        n = jnp.sqrt(jnp.sum(x * x, axis=1, keepdims=True))
        return x / jnp.maximum(n, 1e-12)

    zi = l2_normalize(emb_i)
    zj = l2_normalize(emb_j)

    if block_rows is None:
        # MXU-sized row tiles: 256 (v6e/v7x native width), then 128 (v5e),
        # otherwise the whole batch in one tile (small / odd batch sizes).
        block_rows = B
        for cand in (256, 128):
            if B % cand == 0:
                block_rows = cand
                break
    TB = int(min(block_rows, B))
    assert B % TB == 0, "batch size must be divisible by the row tile"
    num_tiles = B // TB

    kernel = functools.partial(
        _ntxent_kernel, block_rows=TB, temperature=float(temperature))

    per_row = pl.pallas_call(
        kernel,
        out_shape=jax.ShapeDtypeStruct((2, B), jnp.float32),
        grid_spec=pltpu.PrefetchScalarGridSpec(
            num_scalar_prefetch=0,
            grid=(num_tiles,),
            in_specs=[
                pl.BlockSpec((B, D), lambda r: (0, 0)),   # normalized i half (resident)
                pl.BlockSpec((B, D), lambda r: (0, 0)),   # normalized j half (resident)
            ],
            # Lane-dense output: batch on the lane axis, 2 halves on sublanes.
            out_specs=pl.BlockSpec((2, TB), lambda r: (0, r)),
        ),
        compiler_params=pltpu.CompilerParams(
            dimension_semantics=("parallel",),   # row tiles shard across TCs (v7x)
            vmem_limit_bytes=48 << 20,           # fits v7x 64 MiB/TC; fine on v5e/v6e
        ),
    )(zi, zj)

    # Tiny final mean left to XLA (no lane-sparse scalar writeback in-kernel).
    return jnp.sum(per_row) / (2.0 * B)


def _ntxent_reference(emb_i, emb_j, temperature=0.5):
    """Pure-JAX reference mirroring the PyTorch module."""
    B = emb_i.shape[0]

    def norm(x):
        n = jnp.sqrt(jnp.sum(x * x, axis=1, keepdims=True))
        return x / jnp.maximum(n, 1e-12)

    z = jnp.concatenate([norm(emb_i), norm(emb_j)], axis=0)
    sim = z @ z.T
    sim_ij = jnp.diagonal(sim, offset=B)
    sim_ji = jnp.diagonal(sim, offset=-B)
    positives = jnp.concatenate([sim_ij, sim_ji], axis=0)
    nominator = jnp.exp(positives / temperature)
    neg_mask = 1.0 - jnp.eye(2 * B)
    denominator = jnp.sum(neg_mask * jnp.exp(sim / temperature), axis=1)
    loss_partial = -jnp.log(nominator / denominator)
    return jnp.sum(loss_partial) / (2 * B)


if __name__ == "__main__":
    # NTXent(batch_size=8, temperature=0.5); embeddings of dim 128.
    B, D = 8, 128
    key = jax.random.PRNGKey(0)
    ki, kj = jax.random.split(key)
    emb_i = jax.random.normal(ki, (B, D), dtype=jnp.float32)
    emb_j = jax.random.normal(kj, (B, D), dtype=jnp.float32)

    loss = ntxent_loss(emb_i, emb_j, temperature=0.5)
    jax.block_until_ready(loss)

    ref = _ntxent_reference(emb_i, emb_j, temperature=0.5)
    # bf16 MXU operands => expect ~1e-3 relative error on the loss.
    assert jnp.allclose(loss, ref, rtol=1e-2, atol=1e-2), (loss, ref)

    print("KERNEL_OK")
</pallas_src>

<mosaic_0001>
module attributes {stable_mosaic.version = 11 : i64} {
  func.func @_ntxent_kernel(%arg0: i32, %arg1: memref<8x128xf32, #tpu.memory_space<vmem>>, %arg2: memref<8x128xf32, #tpu.memory_space<vmem>>, %arg3: memref<2x8xf32, #tpu.memory_space<vmem>>) attributes {dimension_semantics = [#tpu.dimension_semantics<parallel>], iteration_bounds = array<i64: 1>, scalar_prefetch = 0 : i64, scratch_operands = 0 : i64, tpu.core_type = #tpu.core_type<tc>, window_params = [{pipeline_mode = #tpu.pipeline_mode<synchronous>, transform_indices = @transform_0, window_bounds = array<i64: 8, 128>}, {pipeline_mode = #tpu.pipeline_mode<synchronous>, transform_indices = @transform_1, window_bounds = array<i64: 8, 128>}, {transform_indices = @transform_2, window_bounds = array<i64: 2, 8>}]} {
    %c8_i32 = arith.constant 8 : i32
    %0 = arith.muli %arg0, %c8_i32 : i32
    %1 = tpu.assume_multiple %0, 8 : i32
    %c0 = arith.constant 0 : index
    %c0_0 = arith.constant 0 : index
    %2 = vector.load %arg1[%c0, %c0_0] : memref<8x128xf32, #tpu.memory_space<vmem>>, vector<8x128xf32>
    %c0_1 = arith.constant 0 : index
    %c0_2 = arith.constant 0 : index
    %3 = vector.load %arg2[%c0_1, %c0_2] : memref<8x128xf32, #tpu.memory_space<vmem>>, vector<8x128xf32>
    %4 = arith.index_cast %1 : i32 to index
    %c0_3 = arith.constant 0 : index
    %5 = vector.load %arg1[%4, %c0_3] : memref<8x128xf32, #tpu.memory_space<vmem>>, vector<8x128xf32>
    %6 = arith.index_cast %1 : i32 to index
    %c0_4 = arith.constant 0 : index
    %7 = vector.load %arg2[%6, %c0_4] : memref<8x128xf32, #tpu.memory_space<vmem>>, vector<8x128xf32>
    %8 = arith.mulf %5, %7 : vector<8x128xf32>
    %cst = arith.constant dense<0.000000e+00> : vector<8xf32>
    %9 = vector.multi_reduction <add>, %8, %cst [1] : vector<8x128xf32> to vector<8xf32>
    %10 = arith.truncf %2 : vector<8x128xf32> to vector<8x128xbf16>
    %11 = arith.truncf %3 : vector<8x128xf32> to vector<8x128xbf16>
    %12 = arith.truncf %5 : vector<8x128xf32> to vector<8x128xbf16>
    %13 = arith.truncf %7 : vector<8x128xf32> to vector<8x128xbf16>
    %14 = arith.extf %12 : vector<8x128xbf16> to vector<8x128xf32>
    %15 = arith.mulf %14, %14 : vector<8x128xf32>
    %cst_5 = arith.constant dense<0.000000e+00> : vector<8xf32>
    %16 = vector.multi_reduction <add>, %15, %cst_5 [1] : vector<8x128xf32> to vector<8xf32>
    %cst_6 = arith.constant 2.000000e+00 : f32
    %17 = vector.broadcast %cst_6 : f32 to vector<8xf32>
    %18 = arith.mulf %16, %17 : vector<8xf32>
    %19 = math.exp %18 : vector<8xf32>
    %20 = arith.extf %13 : vector<8x128xbf16> to vector<8x128xf32>
    %21 = arith.mulf %20, %20 : vector<8x128xf32>
    %cst_7 = arith.constant dense<0.000000e+00> : vector<8xf32>
    %22 = vector.multi_reduction <add>, %21, %cst_7 [1] : vector<8x128xf32> to vector<8xf32>
    %cst_8 = arith.constant 2.000000e+00 : f32
    %23 = vector.broadcast %cst_8 : f32 to vector<8xf32>
    %24 = arith.mulf %22, %23 : vector<8xf32>
    %25 = math.exp %24 : vector<8xf32>
    %cst_9 = arith.constant dense<0.000000e+00> : vector<8x8xf32>
    %26 = tpu.matmul %12, %10, %cst_9 {dimension_numbers = #tpu.dot_dimension_numbers<[1], [1], [0], [0], [0, 0, 1, 0], [], []>} : vector<8x128xbf16>, vector<8x128xbf16>, vector<8x8xf32> -> vector<8x8xf32>
    %cst_10 = arith.constant 2.000000e+00 : f32
    %27 = vector.broadcast %cst_10 : f32 to vector<8x8xf32>
    %28 = arith.mulf %26, %27 : vector<8x8xf32>
    %29 = math.exp %28 : vector<8x8xf32>
    %cst_11 = arith.constant dense<0.000000e+00> : vector<8xf32>
    %30 = vector.multi_reduction <add>, %29, %cst_11 [1] : vector<8x8xf32> to vector<8xf32>
    %31 = arith.subf %30, %19 : vector<8xf32>
    %cst_12 = arith.constant dense<0.000000e+00> : vector<8x8xf32>
    %32 = tpu.matmul %12, %11, %cst_12 {dimension_numbers = #tpu.dot_dimension_numbers<[1], [1], [0], [0], [0, 0, 1, 0], [], []>} : vector<8x128xbf16>, vector<8x128xbf16>, vector<8x8xf32> -> vector<8x8xf32>
    %cst_13 = arith.constant 2.000000e+00 : f32
    %33 = vector.broadcast %cst_13 : f32 to vector<8x8xf32>
    %34 = arith.mulf %32, %33 : vector<8x8xf32>
    %35 = math.exp %34 : vector<8x8xf32>
    %cst_14 = arith.constant dense<0.000000e+00> : vector<8xf32>
    %36 = vector.multi_reduction <add>, %35, %cst_14 [1] : vector<8x8xf32> to vector<8xf32>
    %37 = arith.addf %31, %36 : vector<8xf32>
    %cst_15 = arith.constant dense<0.000000e+00> : vector<8x8xf32>
    %38 = tpu.matmul %13, %11, %cst_15 {dimension_numbers = #tpu.dot_dimension_numbers<[1], [1], [0], [0], [0, 0, 1, 0], [], []>} : vector<8x128xbf16>, vector<8x128xbf16>, vector<8x8xf32> -> vector<8x8xf32>
    %cst_16 = arith.constant 2.000000e+00 : f32
    %39 = vector.broadcast %cst_16 : f32 to vector<8x8xf32>
    %40 = arith.mulf %38, %39 : vector<8x8xf32>
    %41 = math.exp %40 : vector<8x8xf32>
    %cst_17 = arith.constant dense<0.000000e+00> : vector<8xf32>
    %42 = vector.multi_reduction <add>, %41, %cst_17 [1] : vector<8x8xf32> to vector<8xf32>
    %43 = arith.subf %42, %25 : vector<8xf32>
    %cst_18 = arith.constant dense<0.000000e+00> : vector<8x8xf32>
    %44 = tpu.matmul %13, %10, %cst_18 {dimension_numbers = #tpu.dot_dimension_numbers<[1], [1], [0], [0], [0, 0, 1, 0], [], []>} : vector<8x128xbf16>, vector<8x128xbf16>, vector<8x8xf32> -> vector<8x8xf32>
    %cst_19 = arith.constant 2.000000e+00 : f32
    %45 = vector.broadcast %cst_19 : f32 to vector<8x8xf32>
    %46 = arith.mulf %44, %45 : vector<8x8xf32>
    %47 = math.exp %46 : vector<8x8xf32>
    %cst_20 = arith.constant dense<0.000000e+00> : vector<8xf32>
    %48 = vector.multi_reduction <add>, %47, %cst_20 [1] : vector<8x8xf32> to vector<8xf32>
    %49 = arith.addf %43, %48 : vector<8xf32>
    %50 = math.log %37 : vector<8xf32>
    %cst_21 = arith.constant 2.000000e+00 : f32
    %51 = vector.broadcast %cst_21 : f32 to vector<8xf32>
    %52 = arith.mulf %9, %51 : vector<8xf32>
    %53 = arith.subf %50, %52 : vector<8xf32>
    %c0_22 = arith.constant 0 : index
    %c0_23 = arith.constant 0 : index
    %54 = vector.load %arg3[%c0_22, %c0_23] : memref<2x8xf32, #tpu.memory_space<vmem>>, vector<1x8xf32>
    %55 = vector.shape_cast %54 : vector<1x8xf32> to vector<8xf32>
    %56 = vector.shape_cast %53 : vector<8xf32> to vector<1x8xf32>
    tpu.vector_store %arg3[%c0_22, %c0_23], %56 {strides = array<i32>} : memref<2x8xf32, #tpu.memory_space<vmem>>, vector<1x8xf32>,
    %57 = math.log %49 : vector<8xf32>
    %cst_24 = arith.constant 2.000000e+00 : f32
    %58 = vector.broadcast %cst_24 : f32 to vector<8xf32>
    %59 = arith.mulf %9, %58 : vector<8xf32>
    %60 = arith.subf %57, %59 : vector<8xf32>
    %c1 = arith.constant 1 : index
    %c0_25 = arith.constant 0 : index
    %61 = vector.load %arg3[%c1, %c0_25] : memref<2x8xf32, #tpu.memory_space<vmem>>, vector<1x8xf32>
    %62 = vector.shape_cast %61 : vector<1x8xf32> to vector<8xf32>
    %63 = vector.shape_cast %60 : vector<8xf32> to vector<1x8xf32>
    tpu.vector_store %arg3[%c1, %c0_25], %63 {strides = array<i32>} : memref<2x8xf32, #tpu.memory_space<vmem>>, vector<1x8xf32>,
    return
  }
  func.func @transform_0(%arg0: i32) -> (i32, i32) {
    %c0_i32 = arith.constant 0 : i32
    %c0_i32_0 = arith.constant 0 : i32
    %c0_i32_1 = arith.constant 0 : i32
    return %c0_i32, %c0_i32_0 : i32, i32
  }
  func.func @transform_1(%arg0: i32) -> (i32, i32) {
    %c0_i32 = arith.constant 0 : i32
    %c0_i32_0 = arith.constant 0 : i32
    %c0_i32_1 = arith.constant 0 : i32
    return %c0_i32, %c0_i32_0 : i32, i32
  }
  func.func @transform_2(%arg0: i32) -> (i32, i32) {
    %c0_i32 = arith.constant 0 : i32
    %c0_i32_0 = arith.constant 0 : i32
    return %c0_i32, %arg0 : i32, i32
  }
}

</mosaic_0001>

<bundles_post_ra>
// kernel: tpu_custom_call.1
= control target key start
LH: loop header
LB: loop body
LE: loop exit
PB: predicated region body
PF: predicated region fallthrough
CT: control target
= control target key end

     0   :  { %7 = vsyncpa [#allocation3], 0  ;;  %s446_s0 = inlined_call_operand.hbm [shape: f32[8,128], index: 0, kind: input, shape index: {}]   ;;  %s447_s1 = inlined_call_operand.hbm [shape: f32[8,128], index: 1, kind: input, shape index: {}]   ;;  %s448_s2 = inlined_call_operand.hbm [shape: f32[2,8], index: 2, kind: output, shape index: {}]  }
   0x1   :  { %8 = vsyncpa [#allocation6], 0 }
   0x2   :  { %9 = vsyncpa [#allocation4], 0  ;;  %s413_s9 = smov [#allocation2]   ;;  %s414_s11 = smov [#allocation5]  }
   0x3   :  { %s16_s10 = sshll.u32 %s413_s9, 4  ;;  %s26_s12 = sshll.u32 %s414_s11, 4  ;;  %s17_s10 = int_to_ptr.vmem [resolvable:$true] %s16_s10  ;;  %s27_s12 = int_to_ptr.vmem [resolvable:$true] %s26_s12 }
   0x4   :  { %s355_s13 = scalar_lea.vmem %s17_s10, 128  ;;  %p360_p1 = scmp.lt.s32.totalorder %s17_s10, %s17_s10 }
   0x5   :  { %p356_p0 = scmp.ne.s32.totalorder %s17_s10, %s355_s13  ;;  %p361_p2 = scmp.lt.s32.totalorder %s355_s13, %s355_s13 }
   0x7   :  { %p362_p3 = por %p361_p2, %p360_p1 }
   0x9   :  { %p363_p4 = pnand %p362_p3, %p356_p0 }
   0xb   :  { %366 = shalt.err (!%p363_p4)
}
   0xc   :  { %19 = dma.hbm_to_vmem [thread:$0]  %s446_s0, 128, %s17_s10, [#allocation3]  }
   0xd   :  { %s375_s16 = scalar_lea.vmem %s27_s12, 128  ;;  %p380_p6 = scmp.lt.s32.totalorder %s27_s12, %s27_s12 }
   0xe   :  { %p376_p5 = scmp.ne.s32.totalorder %s27_s12, %s375_s16  ;;  %p381_p7 = scmp.lt.s32.totalorder %s375_s16, %s375_s16 }
  0x10   :  { %p382_p8 = por %p381_p7, %p380_p6 }
  0x12   :  { %p383_p9 = pnand %p382_p8, %p376_p5 }
  0x14   :  { %386 = shalt.err (!%p383_p9)
}
  0x15   :  { %29 = dma.hbm_to_vmem [thread:$0]  %s447_s1, 128, %s27_s12, [#allocation6]  }
  0x16   :  { %407 = dma.done.wait [#allocation3], 128  }
  0x17   :  { %408 = vsyncadd [#allocation3], 4294967168 }
  0x18   :  { %409 = dma.done.wait [#allocation6], 128  }
  0x19   :  { %410 = vsyncadd [#allocation6], 4294967168  ;;  %v415_v0 = vmov 0.0   ;;  %vm416_vm0 = vmmov 0   ;;  %v38_v1 = vld [vmem:[#allocation2] sm:$0xff]  ;;  %v39_v2 = vld [vmem:[#allocation5] sm:$0xff]  ;;  %v259_v56 = vlaneseq }
  0x1a   :  { %302 = vmatprep.subr.bf16.mxu0 %v415_v0  ;;  %308 = vmatprep.subr.bf16.mxu1 %v415_v0  ;;  %v47_v3 = vpack.c.bf16 %v38_v1, %v38_v1  ;;  %v48_v4 = vpack.c.bf16 %v39_v2, %v39_v2  ;;  %vm108_vm1 = vcmask 64512   ;;  %v44_v37 = vmul.f32 %v39_v2, %v38_v1  ;;  %s417_s0 = smov [#allocation7]  }
  0x1b   :  { %304 = vmatprep.mubr.msk.bf16.mxu0 %vm416_vm0, %v415_v0  ;;  %310 = vmatprep.mubr.msk.bf16.mxu1 %vm416_vm0, %v415_v0  ;;  %v260_v60 = vand.u32 127, %v259_v56  ;;  %v262_v61 = vshrl.u32 %v259_v56, 7  ;;  %vm266_vm2 = vcmask 57344   ;;  %s284_s1 = sshll.u32 %s417_s0, 4  ;;  %s285_s1 = int_to_ptr.vmem [resolvable:$true] %s284_s1 }
  0x1c   :  { %303 = vmatpush3.bf16.xpose.msra.mxu0 %v47_v3  ;;  %309 = vmatpush3.bf16.xpose.msra.mxu1 %v48_v4  ;;  %v51_v5 = vunpack.c.l.bf16 %v47_v3  ;;  %v58_v7 = vunpack.c.l.bf16 %v48_v4  ;;  %s387_s19 = scalar_lea.vmem %s285_s1, 32  ;;  %p392_p11 = scmp.lt.s32.totalorder %s285_s1, %s285_s1 }
  0x1d   :  { %314 = vmatprep.subr.bf16.mxu0 %v415_v0  ;;  %320 = vmatprep.subr.bf16.mxu1 %v415_v0  ;;  %p388_p10 = scmp.ne.s32.totalorder %s285_s1, %s387_s19  ;;  %p393_p12 = scmp.lt.s32.totalorder %s387_s19, %s387_s19 }
  0x1e   :  { %v52_v6 = vmul.f32 %v51_v5, %v51_v5  ;;  %v59_v8 = vmul.f32 %v58_v7, %v58_v7 }
  0x1f   :  { %p394_p13 = por %p393_p12, %p392_p11 }
  0x20   :  { %53 = vadd.xlane.f32.xlu0 %v52_v6 }
  0x21   :  { %p395_p0 = pnand %p394_p13, %p388_p10 }
  0x23   :  { %305 = vmatmul.mubr.bf16.vlgmr.msra.gmra.mxu0 %v47_v3  ;;  %311 = vmatmul.mubr.bf16.vlgmr.msra.gmra.mxu1 %v47_v3 }
  0x24   :  { %315 = vmatpush3.bf16.xpose.msra.mxu0 %v48_v4  ;;  %321 = vmatpush3.bf16.xpose.msra.mxu1 %v47_v3 }
  0x25   :  { %316 = vmatprep.mubr.msk.bf16.mxu0 %vm416_vm0, %v415_v0  ;;  %322 = vmatprep.mubr.msk.bf16.mxu1 %vm416_vm0, %v415_v0  ;;  %v263_v0 = vsub.s32 %v260_v60, %v262_v61 }
  0x26   :  { %60 = vadd.xlane.f32.xlu0 %v59_v8 }
  0x2b   :  { %317 = vmatmul.mubr.bf16.vlgmr.msra.gmra.mxu0 %v48_v4  ;;  %323 = vmatmul.mubr.bf16.vlgmr.msra.gmra.mxu1 %v48_v4 }
  0xa9   :  { %v54_v42 = vpop.xlane.xlu0 %53 }
  0xaa   :  { %v55_v43 = vmul.f32 2.0, %v54_v42 }
  0xac   :  { %v56_v44 = vmul.f32 1.442695, %v55_v43 }
  0xaf   :  { %v61_v45 = vpop.xlane.xlu0 %60 }
  0xb0   :  { %v62_v46 = vmul.f32 2.0, %v61_v45 }
  0xb2   :  { %v63_v47 = vmul.f32 1.442695, %v62_v46 }
  0xe3   :  { %v99_v9 = vpop.f32.mrf.mxu0  ;;  %v147_v10 = vpop.f32.mrf.mxu1 }
  0xe4   :  { %v105_v11 = vmul.f32 2.0, %v99_v9  ;;  %v153_v12 = vmul.f32 2.0, %v147_v10 }
  0xe5   :  { %v306_v13 = vpop.f32.mrf.mxu0  ;;  %v312_v14 = vpop.f32.mrf.mxu1 }
  0xe6   :  { %v106_v15 = vmul.f32 1.442695, %v105_v11  ;;  %v154_v16 = vmul.f32 1.442695, %v153_v12 }
  0xe7   :  { %v102_v17 = vpop.f32.mrf.mxu0  ;;  %v150_v18 = vpop.f32.mrf.mxu1 }
  0xe8   :  { %331 = vpow2.f32 %v106_v15 }
  0xe9   :  { %333 = vpow2.f32 %v154_v16  ;;  %v307_v19 = vpop.f32.mrf.mxu0  ;;  %v313_v20 = vpop.f32.mrf.mxu1 }
  0xeb   :  { %v194_v21 = vpop.f32.mrf.mxu0  ;;  %v241_v22 = vpop.f32.mrf.mxu1 }
  0xec   :  { %v200_v23 = vmul.f32 2.0, %v194_v21  ;;  %v247_v24 = vmul.f32 2.0, %v241_v22 }
  0xed   :  { %v318_v25 = vpop.f32.mrf.mxu0  ;;  %v324_v26 = vpop.f32.mrf.mxu1 }
  0xee   :  { %v201_v27 = vmul.f32 1.442695, %v200_v23  ;;  %v248_v28 = vmul.f32 1.442695, %v247_v24 }
  0xef   :  { %v197_v29 = vpop.f32.mrf.mxu0  ;;  %v244_v30 = vpop.f32.mrf.mxu1 }
  0xf0   :  { %335 = vpow2.f32 %v201_v27 }
  0xf1   :  { %337 = vpow2.f32 %v248_v28  ;;  %v319_v31 = vpop.f32.mrf.mxu0  ;;  %v325_v32 = vpop.f32.mrf.mxu1 }
  0xf2   :  { %339 = vpow2.f32 %v56_v44 }
  0xf3   :  { %341 = vpow2.f32 %v63_v47 }
  0xf5   :  { %v332_v33 = vpop.eup %331 }
  0xf6   :  { %v334_v34 = vpop.eup %333  ;;  %v109_v35 = vsel %vm108_vm1, %v332_v33, 0.0 }
  0xf7   :  { %110 = vadd.xlane.f32.xlu1 %v109_v35  ;;  %v156_v36 = vsel %vm108_vm1, %v334_v34, 0.0 }
  0xf8   :  { %157 = vadd.xlane.f32.xlu0 %v156_v36 }
  0xfc   :  { %45 = vadd.xlane.f32.xlu0 %v44_v37 }
  0xfd   :  { %v336_v38 = vpop.eup %335 }
  0xfe   :  { %v338_v39 = vpop.eup %337  ;;  %v203_v40 = vsel %vm108_vm1, %v336_v38, 0.0 }
  0xff   :  { %204 = vadd.xlane.f32.xlu1 %v203_v40  ;;  %v250_v41 = vsel %vm108_vm1, %v338_v39, 0.0  ;;  %v340_v48 = vpop.eup %339 }
 0x100   :  { %v342_v53 = vpop.eup %341 }
 0x103   :  { %251 = vadd.xlane.f32.xlu1 %v250_v41 }
 0x180   :  { %v111_v49 = vpop.xlane.xlu1 %110 }
 0x181   :  { %v112_v50 = vsub.f32 %v111_v49, %v340_v48  ;;  %v158_v51 = vpop.xlane.xlu0 %157 }
 0x183   :  { %v159_v52 = vadd.f32 %v158_v51, %v112_v50 }
 0x185   :  { %343 = vlog2.f32 %v159_v52  ;;  %v46_v59 = vpop.xlane.xlu0 %45 }
 0x186   :  { %v256_v62 = vmul.f32 2.0, %v46_v59 }
 0x188   :  { %v205_v54 = vpop.xlane.xlu1 %204 }
 0x189   :  { %v206_v55 = vsub.f32 %v205_v54, %v342_v53 }
 0x18c   :  { %v252_v57 = vpop.xlane.xlu1 %251 }
 0x18d   :  { %v253_v58 = vadd.f32 %v252_v57, %v206_v55 }
 0x18f   :  { %345 = vlog2.f32 %v253_v58 }
 0x192   :  { %v344_v63 = vpop.eup %343 }
 0x193   :  { %v255_v1 = vmul.f32 0.6931472, %v344_v63 }
 0x195   :  { %v257_v2 = vsub.f32 %v255_v1, %v256_v62 }
 0x197   :  { %v264_v3 = vrot.slane %v257_v2, %v263_v0 }
 0x199   :  { %267 = vst.msk [vmem:[#allocation7] sm:$0x1] %vm266_vm2, %v264_v3 }
 0x19c   :  { %v346_v4 = vpop.eup %345 }
 0x19d   :  { %v269_v5 = vmul.f32 0.6931472, %v346_v4 }
 0x19f   :  { %v270_v6 = vsub.f32 %v269_v5, %v256_v62 }
 0x1a1   :  { %v275_v7 = vrot.slane %v270_v6, %v263_v0 }
 0x1a3   :  { %277 = vst.msk [vmem:[#allocation7 + $0x1] sm:$0x1] %vm266_vm2, %v275_v7 }
 0x1a4   :  { %398 = shalt.err (!%p395_p0)
}
 0x1a5   :  { %287 = dma.vmem_to_hbm [thread:$0]  %s285_s1, 32, %s448_s2, [#allocation4]  }
 0x1a6   :  { %411 = dma.done.wait [#allocation4], 32  }
 0x1a7   :  { %412 = vsyncadd [#allocation4], 4294967264 }
 0x1a8   :  { %291 = vsyncpa [#allocation3], 1 }
 0x1a9   :  { %292 = vsyncpa [#allocation6], 1 }
 0x1aa   :  { %293 = vsyncpa [#allocation4], 1 }

</bundles_post_ra>
